<compile_context>
chip_gen: v6e
topology: v6e:2x2x1
jax: 0.10.0
libtpu: 0.0.40
codegen_flags: <defaults>
</compile_context>

<pallas_src>
import functools

import jax
import jax.numpy as jnp
from jax.experimental import pallas as pl
from jax.experimental.pallas import tpu as pltpu


_LANES = 128
_SUBLANES = 8
_MiB = 1024 * 1024


def _round_up(x, mult):
    return ((x + mult - 1) // mult) * mult


# --------------------------------------------------------------------------------------
# Hardware detection (perf-only; conservative v7x-like defaults if detection fails).
# --------------------------------------------------------------------------------------
@functools.lru_cache(maxsize=1)
def _tpu_generation():
    """Returns (tensorcores_per_chip, is_big_vmem_generation)."""
    kind = ""
    try:
        kind = jax.devices()[0].device_kind.lower()
    except Exception:  # detection only — never affects correctness
        pass
    big_vmem = ("v5" in kind) or ("v6" in kind)   # 128 MiB VMEM, 1 TC per chip
    cores = 1 if big_vmem else 2                  # v7x (and unknown/newer): assume 2 TCs
    return cores, big_vmem


@functools.lru_cache(maxsize=1)
def _vmem_budgets():
    """Returns (vmem_limit_bytes, tiling_budget_bytes) for this chip generation."""
    _, big_vmem = _tpu_generation()
    if big_vmem:                       # v5e / v6e: 128 MiB physical VMEM
        return 110 * _MiB, 96 * _MiB
    return 48 * _MiB, 40 * _MiB        # v7x: 64 MiB per TC — leave compiler headroom


@functools.lru_cache(maxsize=1)
def _pipeline_mode_supported():
    """One-time explicit capability check for BlockSpec(pipeline_mode=pl.Buffered(k)).

    Probes a tiny synthetic kernel only, so a genuine failure of the *real* kernel
    (VMEM OOM, misconfiguration) is never misclassified as "Buffered unsupported"."""
    try:
        def _k(x_ref, y_ref, o_ref):
            o_ref[...] = x_ref[...] + y_ref[...]

        fn = pl.pallas_call(
            _k,
            out_shape=jax.ShapeDtypeStruct((32, 128), jnp.float32),
            grid=(4,),
            in_specs=[
                pl.BlockSpec((8, 128), lambda i: (i, 0), pipeline_mode=pl.Buffered(3)),
                pl.BlockSpec((8, 128), lambda i: (0, 0), pipeline_mode=pl.Buffered(1)),
            ],
            out_specs=pl.BlockSpec((8, 128), lambda i: (i, 0)),
        )
        x = jax.ShapeDtypeStruct((32, 128), jnp.float32)
        y = jax.ShapeDtypeStruct((8, 128), jnp.float32)
        jax.jit(fn).lower(x, y).compile()
        return True
    except Exception:
        return False


# --------------------------------------------------------------------------------------
# Tile sizing.
# --------------------------------------------------------------------------------------
def _per_row_bytes(d, a, x_itemsize, in_bufs):
    """Conservative VMEM bytes per row of a fused tile (I/O buffers + intermediates)."""
    return (in_bufs * x_itemsize * d      # pipelined x tiles
            + 2 * 4 * a                   # double-buffered output tiles (f32 worst case)
            + 16 * d                      # in-kernel f32 h1/h2 + bf16 casts
            + 8 * a)                      # final f32 accumulator / store staging


def _pick_tile_m(m, avail, per_row, cores):
    cap = 2048 if cores <= 1 else 1024
    tile = avail // per_row if avail > 0 else _SUBLANES
    tile = max(_SUBLANES, min(cap, tile))
    tile = min(tile, _round_up(m, _SUBLANES))            # never exceed the work
    if cores >= 2 and m >= 2 * _SUBLANES:
        # Keep >=2 grid steps only on multi-TensorCore parts so both cores get work.
        tile = min(tile, _round_up(pl.cdiv(m, cores), _SUBLANES))
    return int(max(_SUBLANES, (tile // _SUBLANES) * _SUBLANES))


# --------------------------------------------------------------------------------------
# Fused 3-layer MLP kernel (weights VMEM-resident).
# --------------------------------------------------------------------------------------
def _mlp_kernel(x_ref, w1_ref, b1_ref, w2_ref, b2_ref, w3_ref, b3_ref, o_ref):
    """x tile -> Linear+ReLU -> Linear+ReLU -> Linear.  bf16 MXU inputs, f32 accum."""
    compute_dtype = w1_ref.dtype
    x = x_ref[...]
    if x.dtype != compute_dtype:          # static (trace-time) check: no cast if bf16 in
        x = x.astype(compute_dtype)

    h = jnp.dot(x, w1_ref[...], preferred_element_type=jnp.float32) + b1_ref[...]
    h = jnp.maximum(h, 0.0).astype(compute_dtype)

    h = jnp.dot(h, w2_ref[...], preferred_element_type=jnp.float32) + b2_ref[...]
    h = jnp.maximum(h, 0.0).astype(compute_dtype)

    out = jnp.dot(h, w3_ref[...], preferred_element_type=jnp.float32) + b3_ref[...]
    o_ref[...] = out.astype(o_ref.dtype)


@functools.partial(jax.jit, static_argnums=(2, 3, 4, 5))
def _fused_forward(enc, params, tile_m, weight_bufs, in_bufs, vmem_limit_bytes):
    w1, b1, w2, b2, w3, b3 = params
    n, l, d = enc.shape
    a = w3.shape[1]
    m = n * l
    x = enc.reshape(m, d)

    def spec(shape, index_map, bufs):
        if bufs:
            return pl.BlockSpec(shape, index_map, pipeline_mode=pl.Buffered(bufs))
        return pl.BlockSpec(shape, index_map)

    def resident(shape):
        # Constant block index -> fetched once, never re-fetched across the grid;
        # Buffered(1) (when supported) drops the pointless second buffer.
        return spec(shape, lambda i: (0, 0), weight_bufs)

    grid = (pl.cdiv(m, tile_m),)   # no host-side row padding: partial last block is masked

    flops = 2 * m * (d * d + d * d + d * a)
    bytes_accessed = (m * d * x.dtype.itemsize
                      + (2 * d * d + d * a) * w1.dtype.itemsize
                      + (2 * d + a) * b1.dtype.itemsize
                      + m * a * enc.dtype.itemsize)

    out = pl.pallas_call(
        _mlp_kernel,
        out_shape=jax.ShapeDtypeStruct((m, a), enc.dtype),
        grid_spec=pltpu.PrefetchScalarGridSpec(
            num_scalar_prefetch=0,
            grid=grid,
            in_specs=[
                spec((tile_m, d), lambda i: (i, 0), in_bufs),   # streamed x row tile
                resident((d, d)),                               # w1
                resident((1, d)),                               # b1
                resident((d, d)),                               # w2
                resident((1, d)),                               # b2
                resident((d, a)),                               # w3
                resident((1, a)),                               # b3
            ],
            # Unpadded output: no extra host-side lane-unpad slice / HBM pass.
            out_specs=pl.BlockSpec((tile_m, a), lambda i: (i, 0)),
        ),
        compiler_params=pltpu.CompilerParams(
            dimension_semantics=("parallel",),
            vmem_limit_bytes=vmem_limit_bytes,
        ),
        cost_estimate=pl.CostEstimate(
            flops=flops, transcendentals=0, bytes_accessed=bytes_accessed),
    )(x, w1, b1, w2, b2, w3, b3)

    return out.reshape(n, l, a)


# --------------------------------------------------------------------------------------
# Large-d fallback: per-layer K-tiled matmul with an f32 VMEM accumulator.
# --------------------------------------------------------------------------------------
def _linear_kernel(x_ref, w_ref, b_ref, o_ref, acc_ref, *, relu):
    @pl.when(pl.program_id(2) == 0)
    def _():
        acc_ref[...] = jnp.zeros_like(acc_ref)

    x = x_ref[...]
    if x.dtype != w_ref.dtype:
        x = x.astype(w_ref.dtype)
    acc_ref[...] += jnp.dot(x, w_ref[...], preferred_element_type=jnp.float32)

    @pl.when(pl.program_id(2) == pl.num_programs(2) - 1)
    def _():
        r = acc_ref[...] + b_ref[...]
        if relu:
            r = jnp.maximum(r, 0.0)
        o_ref[...] = r.astype(o_ref.dtype)


def _pallas_linear(x, w, b, *, relu, out_dtype, vmem_limit_bytes):
    m, kd = x.shape
    n_out = w.shape[1]
    tm = min(256, _round_up(m, _SUBLANES))
    tn = n_out if n_out <= 512 else 512
    # K tile must divide kd exactly (partial K blocks would pollute the accumulator).
    tk = next((t for t in (512, 256, 128) if kd % t == 0), kd)
    grid = (pl.cdiv(m, tm), pl.cdiv(n_out, tn), kd // tk)

    return pl.pallas_call(
        functools.partial(_linear_kernel, relu=relu),
        out_shape=jax.ShapeDtypeStruct((m, n_out), out_dtype),
        grid_spec=pltpu.PrefetchScalarGridSpec(
            num_scalar_prefetch=0,
            grid=grid,
            in_specs=[
                pl.BlockSpec((tm, tk), lambda i, j, k: (i, k)),
                pl.BlockSpec((tk, tn), lambda i, j, k: (k, j)),
                pl.BlockSpec((1, tn), lambda i, j, k: (0, j)),
            ],
            out_specs=pl.BlockSpec((tm, tn), lambda i, j, k: (i, j)),
            scratch_shapes=[pltpu.VMEM((tm, tn), jnp.float32)],
        ),
        compiler_params=pltpu.CompilerParams(
            dimension_semantics=("parallel", "parallel", "arbitrary"),
            vmem_limit_bytes=vmem_limit_bytes,
        ),
        cost_estimate=pl.CostEstimate(
            flops=2 * m * kd * n_out,
            transcendentals=0,
            bytes_accessed=(m * kd * x.dtype.itemsize
                            + kd * n_out * w.dtype.itemsize
                            + m * n_out * jnp.dtype(out_dtype).itemsize)),
    )(x, w, b)


@functools.partial(jax.jit, static_argnums=(2,))
def _layerwise_forward(enc, params, vmem_limit_bytes):
    w1, b1, w2, b2, w3, b3 = params
    n, l, d = enc.shape
    a = w3.shape[1]
    x = enc.reshape(n * l, d)
    h = _pallas_linear(x, w1, b1, relu=True, out_dtype=w1.dtype,
                       vmem_limit_bytes=vmem_limit_bytes)
    h = _pallas_linear(h, w2, b2, relu=True, out_dtype=w2.dtype,
                       vmem_limit_bytes=vmem_limit_bytes)
    out = _pallas_linear(h, w3, b3, relu=False, out_dtype=enc.dtype,
                         vmem_limit_bytes=vmem_limit_bytes)
    return out.reshape(n, l, a)


# --------------------------------------------------------------------------------------
# Public forward.
# --------------------------------------------------------------------------------------
def synsplore_classifier_forward(enc, params, *, tile_m=None, force_path=None):
    """enc: (N, L, D) f32/bf16  ->  logits: (N, L, n_actions) in enc.dtype."""
    if force_path not in (None, "fused", "layerwise"):
        raise ValueError(f"force_path must be None/'fused'/'layerwise', got {force_path!r}")

    w1, b1, w2, b2, w3, b3 = params
    n, l, d = enc.shape
    a = int(w3.shape[1])
    m = n * l

    vmem_limit, tiling_budget = _vmem_budgets()
    cores, _ = _tpu_generation()
    buffered_ok = _pipeline_mode_supported()

    weight_bufs = 1 if buffered_ok else 0          # 0 => Pallas default (double-buffered)
    n_w_copies = 1 if buffered_ok else 2           # budget the ACTUAL resident footprint
    weight_bytes = n_w_copies * ((2 * d * d + d * a) * w1.dtype.itemsize
                                 + (2 * d + a) * b1.dtype.itemsize)

    in_bufs_budget = 3 if (buffered_ok and d <= 512) else 2
    per_row = _per_row_bytes(d, a, enc.dtype.itemsize, in_bufs_budget)
    avail = tiling_budget - weight_bytes

    if tile_m is None:
        tile_m_ = _pick_tile_m(m, avail, per_row, cores)
    else:
        tile_m_ = max(_SUBLANES, _round_up(int(tile_m), _SUBLANES))

    # Fused (whole-weight-resident) path only if weights fit AND a decent row tile remains.
    fused_ok = avail >= per_row * min(64, _round_up(m, _SUBLANES))
    path = force_path or ("fused" if fused_ok else "layerwise")

    if path == "fused":
        in_bufs = 3 if (buffered_ok and d <= 512 and pl.cdiv(m, tile_m_) >= 3) else 0
        return _fused_forward(enc, params, tile_m_, weight_bufs, in_bufs, vmem_limit)
    return _layerwise_forward(enc, params, vmem_limit)


# --------------------------------------------------------------------------------------
# Params / reference / self-test.
# --------------------------------------------------------------------------------------
def init_params(key, d_model, n_actions, *, weight_dtype=jnp.bfloat16,
                bias_dtype=jnp.float32):
    """Deterministic synthetic init.  Weights stored as (in, out) for x @ W + b;
    weights in bf16 (MXU input dtype), biases in f32."""
    k1, k2, k3, k4, k5, k6 = jax.random.split(key, 6)
    s = 1.0 / (d_model ** 0.5)

    def u(k, shape, dt):
        return jax.random.uniform(k, shape, jnp.float32, -s, s).astype(dt)

    w1 = u(k1, (d_model, d_model), weight_dtype)
    b1 = u(k2, (1, d_model), bias_dtype)
    w2 = u(k3, (d_model, d_model), weight_dtype)
    b2 = u(k4, (1, d_model), bias_dtype)
    w3 = u(k5, (d_model, n_actions), weight_dtype)
    b3 = u(k6, (1, n_actions), bias_dtype)
    return (w1, b1, w2, b2, w3, b3)


def _reference(enc, params):
    """Pure-JAX reference with the same mixed precision (bf16 MXU inputs, f32 accum)."""
    w1, b1, w2, b2, w3, b3 = params
    cdt = w1.dtype
    x = enc.astype(cdt)
    h = jnp.maximum(jnp.dot(x, w1, preferred_element_type=jnp.float32) + b1, 0.0).astype(cdt)
    h = jnp.maximum(jnp.dot(h, w2, preferred_element_type=jnp.float32) + b2, 0.0).astype(cdt)
    return jnp.dot(h, w3, preferred_element_type=jnp.float32) + b3


if __name__ == "__main__":
    # Small shapes consistent with the forward: (N_Batch, max(L_Seq)-1, D_Model)
    N_BATCH, L_SEQ_M1, D_MODEL, N_ACTIONS = 2, 8, 32, 16

    key = jax.random.PRNGKey(0)
    k_enc, k_params = jax.random.split(key)

    enc = jax.random.normal(k_enc, (N_BATCH, L_SEQ_M1, D_MODEL), jnp.float32)
    params = init_params(k_params, D_MODEL, N_ACTIONS)

    ref = _reference(enc, params)

    # Primary fused path.
    logits = synsplore_classifier_forward(enc, params)
    logits = jax.block_until_ready(logits)
    assert logits.shape == (N_BATCH, L_SEQ_M1, N_ACTIONS)
    err = float(jnp.max(jnp.abs(logits - ref.astype(logits.dtype))))
    assert jnp.allclose(logits, ref.astype(logits.dtype), atol=2e-3, rtol=2e-3), err

    # Also exercise the large-d layerwise fallback path at small shapes.
    logits_lw = synsplore_classifier_forward(enc, params, force_path="layerwise")
    logits_lw = jax.block_until_ready(logits_lw)
    err_lw = float(jnp.max(jnp.abs(logits_lw - ref.astype(logits_lw.dtype))))
    assert jnp.allclose(logits_lw, ref.astype(logits_lw.dtype), atol=2e-3, rtol=2e-3), err_lw

    print("KERNEL_OK")
</pallas_src>

<mosaic_0001>
module attributes {stable_mosaic.version = 11 : i64} {
  func.func @_mlp_kernel(%arg0: i32, %arg1: memref<8x32xf32, #tpu.memory_space<vmem>>, %arg2: memref<32x32xbf16, #tpu.memory_space<vmem>>, %arg3: memref<1x32xf32, #tpu.memory_space<vmem>>, %arg4: memref<32x32xbf16, #tpu.memory_space<vmem>>, %arg5: memref<1x32xf32, #tpu.memory_space<vmem>>, %arg6: memref<32x16xbf16, #tpu.memory_space<vmem>>, %arg7: memref<1x16xf32, #tpu.memory_space<vmem>>, %arg8: memref<8x16xf32, #tpu.memory_space<vmem>>) attributes {dimension_semantics = [#tpu.dimension_semantics<parallel>], iteration_bounds = array<i64: 2>, scalar_prefetch = 0 : i64, scratch_operands = 0 : i64, tpu.core_type = #tpu.core_type<tc>, window_params = [{transform_indices = @transform_0, window_bounds = array<i64: 8, 32>}, {pipeline_mode = #tpu.pipeline_mode<synchronous>, transform_indices = @transform_1, window_bounds = array<i64: 32, 32>}, {pipeline_mode = #tpu.pipeline_mode<synchronous>, transform_indices = @transform_2, window_bounds = array<i64: 1, 32>}, {pipeline_mode = #tpu.pipeline_mode<synchronous>, transform_indices = @transform_3, window_bounds = array<i64: 32, 32>}, {pipeline_mode = #tpu.pipeline_mode<synchronous>, transform_indices = @transform_4, window_bounds = array<i64: 1, 32>}, {pipeline_mode = #tpu.pipeline_mode<synchronous>, transform_indices = @transform_5, window_bounds = array<i64: 32, 16>}, {pipeline_mode = #tpu.pipeline_mode<synchronous>, transform_indices = @transform_6, window_bounds = array<i64: 1, 16>}, {transform_indices = @transform_7, window_bounds = array<i64: 8, 16>}]} {
    %c0 = arith.constant 0 : index
    %c0_0 = arith.constant 0 : index
    %0 = vector.load %arg1[%c0, %c0_0] : memref<8x32xf32, #tpu.memory_space<vmem>>, vector<8x32xf32>
    %1 = arith.truncf %0 : vector<8x32xf32> to vector<8x32xbf16>
    %c0_1 = arith.constant 0 : index
    %c0_2 = arith.constant 0 : index
    %2 = vector.load %arg2[%c0_1, %c0_2] : memref<32x32xbf16, #tpu.memory_space<vmem>>, vector<32x32xbf16>
    %cst = arith.constant dense<0.000000e+00> : vector<8x32xf32>
    %3 = tpu.matmul %1, %2, %cst {dimension_numbers = #tpu.dot_dimension_numbers<[1], [0], [0], [1], [0, 0, 1, 1], [], []>} : vector<8x32xbf16>, vector<32x32xbf16>, vector<8x32xf32> -> vector<8x32xf32>
    %c0_3 = arith.constant 0 : index
    %c0_4 = arith.constant 0 : index
    %4 = vector.load %arg3[%c0_3, %c0_4] : memref<1x32xf32, #tpu.memory_space<vmem>>, vector<1x32xf32>
    %5 = vector.broadcast %4 : vector<1x32xf32> to vector<8x32xf32>
    %6 = arith.addf %3, %5 : vector<8x32xf32>
    %cst_5 = arith.constant 0.000000e+00 : f32
    %7 = vector.broadcast %cst_5 : f32 to vector<8x32xf32>
    %8 = arith.maximumf %6, %7 : vector<8x32xf32>
    %9 = arith.truncf %8 : vector<8x32xf32> to vector<8x32xbf16>
    %c0_6 = arith.constant 0 : index
    %c0_7 = arith.constant 0 : index
    %10 = vector.load %arg4[%c0_6, %c0_7] : memref<32x32xbf16, #tpu.memory_space<vmem>>, vector<32x32xbf16>
    %cst_8 = arith.constant dense<0.000000e+00> : vector<8x32xf32>
    %11 = tpu.matmul %9, %10, %cst_8 {dimension_numbers = #tpu.dot_dimension_numbers<[1], [0], [0], [1], [0, 0, 1, 1], [], []>} : vector<8x32xbf16>, vector<32x32xbf16>, vector<8x32xf32> -> vector<8x32xf32>
    %c0_9 = arith.constant 0 : index
    %c0_10 = arith.constant 0 : index
    %12 = vector.load %arg5[%c0_9, %c0_10] : memref<1x32xf32, #tpu.memory_space<vmem>>, vector<1x32xf32>
    %13 = vector.broadcast %12 : vector<1x32xf32> to vector<8x32xf32>
    %14 = arith.addf %11, %13 : vector<8x32xf32>
    %cst_11 = arith.constant 0.000000e+00 : f32
    %15 = vector.broadcast %cst_11 : f32 to vector<8x32xf32>
    %16 = arith.maximumf %14, %15 : vector<8x32xf32>
    %17 = arith.truncf %16 : vector<8x32xf32> to vector<8x32xbf16>
    %c0_12 = arith.constant 0 : index
    %c0_13 = arith.constant 0 : index
    %18 = vector.load %arg6[%c0_12, %c0_13] : memref<32x16xbf16, #tpu.memory_space<vmem>>, vector<32x16xbf16>
    %cst_14 = arith.constant dense<0.000000e+00> : vector<8x16xf32>
    %19 = tpu.matmul %17, %18, %cst_14 {dimension_numbers = #tpu.dot_dimension_numbers<[1], [0], [0], [1], [0, 0, 1, 1], [], []>} : vector<8x32xbf16>, vector<32x16xbf16>, vector<8x16xf32> -> vector<8x16xf32>
    %c0_15 = arith.constant 0 : index
    %c0_16 = arith.constant 0 : index
    %20 = vector.load %arg7[%c0_15, %c0_16] : memref<1x16xf32, #tpu.memory_space<vmem>>, vector<1x16xf32>
    %21 = vector.broadcast %20 : vector<1x16xf32> to vector<8x16xf32>
    %22 = arith.addf %19, %21 : vector<8x16xf32>
    %c0_17 = arith.constant 0 : index
    %c0_18 = arith.constant 0 : index
    %23 = vector.load %arg8[%c0_17, %c0_18] : memref<8x16xf32, #tpu.memory_space<vmem>>, vector<8x16xf32>
    tpu.vector_store %arg8[%c0_17, %c0_18], %22 {strides = array<i32>} : memref<8x16xf32, #tpu.memory_space<vmem>>, vector<8x16xf32>,
    return
  }
  func.func @transform_0(%arg0: i32) -> (i32, i32) {
    %c0_i32 = arith.constant 0 : i32
    %c0_i32_0 = arith.constant 0 : i32
    return %arg0, %c0_i32 : i32, i32
  }
  func.func @transform_1(%arg0: i32) -> (i32, i32) {
    %c0_i32 = arith.constant 0 : i32
    %c0_i32_0 = arith.constant 0 : i32
    %c0_i32_1 = arith.constant 0 : i32
    return %c0_i32, %c0_i32_0 : i32, i32
  }
  func.func @transform_2(%arg0: i32) -> (i32, i32) {
    %c0_i32 = arith.constant 0 : i32
    %c0_i32_0 = arith.constant 0 : i32
    %c0_i32_1 = arith.constant 0 : i32
    return %c0_i32, %c0_i32_0 : i32, i32
  }
  func.func @transform_3(%arg0: i32) -> (i32, i32) {
    %c0_i32 = arith.constant 0 : i32
    %c0_i32_0 = arith.constant 0 : i32
    %c0_i32_1 = arith.constant 0 : i32
    return %c0_i32, %c0_i32_0 : i32, i32
  }
  func.func @transform_4(%arg0: i32) -> (i32, i32) {
    %c0_i32 = arith.constant 0 : i32
    %c0_i32_0 = arith.constant 0 : i32
    %c0_i32_1 = arith.constant 0 : i32
    return %c0_i32, %c0_i32_0 : i32, i32
  }
  func.func @transform_5(%arg0: i32) -> (i32, i32) {
    %c0_i32 = arith.constant 0 : i32
    %c0_i32_0 = arith.constant 0 : i32
    %c0_i32_1 = arith.constant 0 : i32
    return %c0_i32, %c0_i32_0 : i32, i32
  }
  func.func @transform_6(%arg0: i32) -> (i32, i32) {
    %c0_i32 = arith.constant 0 : i32
    %c0_i32_0 = arith.constant 0 : i32
    %c0_i32_1 = arith.constant 0 : i32
    return %c0_i32, %c0_i32_0 : i32, i32
  }
  func.func @transform_7(%arg0: i32) -> (i32, i32) {
    %c0_i32 = arith.constant 0 : i32
    %c0_i32_0 = arith.constant 0 : i32
    return %arg0, %c0_i32 : i32, i32
  }
}

</mosaic_0001>

<bundles_post_ra>
// kernel: _fused_forward.1
= control target key start
LH: loop header
LB: loop body
LE: loop exit
PB: predicated region body
PF: predicated region fallthrough
CT: control target
= control target key end

     0   :  { %12 = vsyncpa [#allocation3], 0  ;;  %s1066_s0 = inlined_call_operand.vmem [shape: f32[16,32], index: 0, kind: input, shape index: {}]   ;;  %s1067_s1 = inlined_call_operand.hbm [shape: bf16[32,32], index: 1, kind: input, shape index: {}]   ;;  %s1068_s2 = inlined_call_operand.vmem [shape: f32[1,32], index: 2, kind: input, shape index: {}]   ;;  %s1069_s3 = inlined_call_operand.hbm [shape: bf16[32,32], index: 3, kind: input, shape index: {}]   ;;  %s1070_s4 = inlined_call_operand.vmem [shape: f32[1,32], index: 4, kind: input, shape index: {}]   ;;  %s1071_s5 = inlined_call_operand.vmem [shape: bf16[32,16], index: 5, kind: input, shape index: {}]   ;;  %s1072_s6 = inlined_call_operand.vmem [shape: f32[1,16], index: 6, kind: input, shape index: {}]   ;;  %s1073_s7 = inlined_call_operand.hbm [shape: f32[16,16], index: 7, kind: output, shape index: {}]  }
   0x1   :  { %13 = vsyncpa [#allocation6], 0 }
   0x2   :  { %14 = vsyncpa [#allocation4], 0 }
   0x3   :  { %16 = vsyncpa [#allocation4 + $0x1], 0  ;;  %s905_s24 = smov 0   ;;  %s907_s25 = smov 0  }
   0x4   :  { %s909_s26 = smov 0   ;;  %s911_s27 = smov 0  }
   0x5 LB: > { %s926_s28 = sadd.s32 4294967295, %s856_s27   ;;  %s607_s29 = sadd.s32 4294967294, %s856_s27   ;;  %s856_s27 = sphi %s911_s27, %s1087_s27   ;;  %s852_s26 = sphi %s909_s26, %s1086_s26   ;;  %s848_s25 = sphi %s907_s25, %s1085_s25   ;;  %s844_s24 = sphi %s905_s24, %s1084_s24  }
   0x6   : > { %s930_s30 = sadd.s32 1, %s856_s27   ;;  %s181_s8 = sadd.s32 1, %s852_s26 }
   0x7   : > { %s178_s9 = ssub.s32 %s856_s27, %s930_s30  ;;  %p191_p0 = scmp.ne.s32.totalorder %s852_s26, %s848_s25 }
   0x8   : > { %p179_p1 = scmp.eq.s32.totalorder %s178_s9, 0  ;;  %p192_p2 = scmp.eq.s32.totalorder %s926_s28, 1 }
   0x9   : > { %p197_p3 = scmp.ne.s32.totalorder %s848_s25, %s844_s24  ;;  %p198_p4 = scmp.eq.s32.totalorder %s607_s29, 1 }
   0xa   : > { %s941_s10 = scalar_select %p179_p1, %s852_s26, %s181_s8  }
   0xb   : > { %p943_p5 = por %p192_p2, %p191_p0  ;;  %p947_p6 = por %p198_p4, %p197_p3 }
   0xc   : > { %p608_p7 = scmp.ge.s32.totalorder %s856_s27, 1  ;;  %p205_p8 = scmp.lt.s32.totalorder %s856_s27, 3 }
   0xd   : > { %s1076_s12 = scalar_select %p947_p6, 1, 0 }
   0xe   : > { %p1074_p9 = scmp.eq.s32.totalorder %s926_s28, 0  ;;  %p954_p10 = pnand %p608_p7, %p205_p8 }
   0xf   : > { %s858_s14 = smov [#allocation2]   ;;  %s859_s17 = smov [#allocation5]  }
  0x10   : > { %s217_s15 = sshll.u32 %s858_s14, 4  ;;  %p676_p11 = pneg %p954_p10  ;;  %s218_s15 = int_to_ptr.vmem [resolvable:$true] %s217_s15 }
  0x11   : > { %s233_s18 = sshll.u32 %s859_s17, 4  ;;  %s747_s19 = scalar_lea.vmem %s218_s15, 256  ;;  %s234_s18 = int_to_ptr.vmem [resolvable:$true] %s233_s18 }
  0x12   : > { %p962_p12 = pnand %p1074_p9, %p676_p11  ;;  %p748_p0 = scmp.ne.s32.totalorder %s218_s15, %s747_s19 }
  0x13   : > { %p755_p3 = scmp.lt.s32.totalorder %s218_s15, %s218_s15  ;;  %p756_p4 = scmp.lt.s32.totalorder %s747_s19, %s747_s19 }
  0x14   : > { %p738_p13 = pneg %p962_p12 }
  0x15   : > { %p757_p7 = por %p756_p4, %p755_p3 }
  0x16   : > { %p750_p1 = pnand %p748_p0, %p738_p13 }
  0x18   : > { %p751_p2 = pneg %p750_p1 }
  0x1a   : > { %p758_p8 = pnand %p757_p7, %p751_p2 }
  0x1c   : > { %761 = shalt.err (!%p758_p8)
}
  0x1d   : > { %s860_s20 = smov 64   ;;  %s861_s21 = smov 4  }
  0x1e   : > { %679 = dma.hbm_to_vmem [thread:$0]  (!%p962_p12), %s1067_s1, 256, %s218_s15, [#allocation3], %s860_s20, %s860_s20, %s861_s21  }
  0x1f   : > { %s773_s29 = scalar_lea.vmem %s234_s18, 256  ;;  %p781_p9 = scmp.lt.s32.totalorder %s234_s18, %s234_s18 }
  0x20   : > { %p774_p11 = scmp.ne.s32.totalorder %s234_s18, %s773_s29  ;;  %p782_p6 = scmp.lt.s32.totalorder %s773_s29, %s773_s29 }
  0x22   : > { %p776_p0 = pnand %p774_p11, %p738_p13  ;;  %p783_p3 = por %p782_p6, %p781_p9 }
  0x24   : > { %p777_p1 = pneg %p776_p0 }
  0x26   : > { %p784_p2 = pnand %p783_p3, %p777_p1 }
  0x28   : > { %787 = shalt.err (!%p784_p2)
}
  0x29   : > { %682 = dma.hbm_to_vmem [thread:$0]  (!%p962_p12), %s1069_s3, 256, %s234_s18, [#allocation6], %s860_s20, %s860_s20, %s861_s21  }
  0x2a   : > { %265 = sbr.rel (%p954_p10) target bundleno = 668 (0x29c), region = 48  ;;  %p1079_p4 = scmp.eq.s32.totalorder (!%p954_p10), %s926_s28, 0 }
  0x2f   : > { %831 = dma.done.wait (%p1079_p4), [#allocation3], 256   ;;  %p1080_p13 = pmov %p1079_p4 }
  0x30   : > { %p1081_p7 = pmov %p1079_p4 }
  0x31   : > { %833 = vsyncadd (%p1080_p13), [#allocation3], 4294967040 }
  0x32   : > { %835 = dma.done.wait (%p1081_p7), [#allocation6], 256   ;;  %p1082_p6 = pmov %p1079_p4 }
  0x33   : > { %p300_p9 = scmp.lt.s32.totalorder %s926_s28, 1  ;;  %v862_v0 = vmov 0.0   ;;  %vm863_vm0 = vmmov 0   ;;  %v730_v1 = vld [vmem:[#allocation2 + $0x8] sm:$0xff]   ;;  %v731_v2 = vld [vmem:[#allocation2] sm:$0xff]   ;;  %vm330_vm1 = vcmask 261120  }
  0x34   : > { %837 = vsyncadd (%p1082_p6), [#allocation6], 4294967040  ;;  %642 = vmatprep.subr.bf16.mxu0 %v862_v0  ;;  %646 = vmatprep.mubr.msk.bf16.mxu0 %vm863_vm0, %v862_v0  ;;  %v732_v5 = vld [vmem:[#allocation5 + $0x8] sm:$0xff]   ;;  %v733_v6 = vld [vmem:[#allocation5] sm:$0xff]   ;;  %s297_s9 = sand.u32 1, %s848_s25   ;;  %s630_s16 = sshll.u32 %s926_s28, 7 }
  0x35   : > { %s301_s13 = scalar_select %p300_p9, %s926_s28, 1  ;;  %650 = vmatprep.subr.bf16.mxu1 %v862_v0  ;;  %654 = vmatprep.mubr.msk.bf16.mxu1 %vm863_vm0, %v862_v0  ;;  %v734_v7 = vld [vmem:[%s1071_s5 + $0x8] sm:$0xff]   ;;  %v617_v8 = vld [vmem:[%s1068_s2] ss:$0 sm:$0xff]  ;;  %vm510_vm2 = vcmask 130048  }
  0x36   : > { %643 = vmatpush3.bf16.msra.mxu0 %v730_v1  ;;  %651 = vmatpush3.bf16.msra.mxu1 %v732_v5  ;;  %v735_v16 = vld [vmem:[%s1071_s5] sm:$0xff]   ;;  %s1025_s21 = scalar_lea.hbm %s1073_s7, %s630_s16  ;;  %s513_s22 = scalar_lea.sflag [#allocation4], %s297_s9 }
  0x37   : > { %s616_s14 = sshll.u32 %s301_s13, 3  ;;  %644 = vmatprep.subr.bf16.mxu0 %v862_v0  ;;  %652 = vmatprep.subr.bf16.mxu1 %v862_v0  ;;  %v621_v17 = vld [vmem:[%s1070_s4] ss:$0 sm:$0xff]  ;;  %s615_s13 = sshll.u32 %s297_s9, 3 }
  0x38   : > { %s303_s17 = scalar_lea.vmem %s1066_s0, %s616_s14  ;;  %v625_v25 = vld [vmem:[%s1072_s6] ss:$0 sm:$0xff]  ;;  %s864_s23 = smov [#allocation7]  }
  0x39   : > { %v305_v3 = vld [vmem:[%s303_s17] sm:$0xff]  ;;  %s299_s17 = scalar_lea.vmem [#allocation7], %s615_s13  ;;  %s792_s29 = sshll.u32 %s864_s23, 4  ;;  %s793_s29 = int_to_ptr.vmem [resolvable:$false] %s792_s29 }
  0x3a   : > { %v306_v4 = vpack.c.bf16 %v305_v3, %v305_v3  ;;  %645 = vmatpush3.bf16.msra.mxu0 %v731_v2  ;;  %653 = vmatpush3.bf16.msra.mxu1 %v733_v6  ;;  %s526_s18 = sshll.u32 %s299_s17, 4  ;;  %s794_s8 = scalar_lea.vmem %s793_s29, 256  ;;  %s1027_s18 = int_to_ptr.vmem [resolvable:$true] %s526_s18 }
  0x3b   : > { %658 = vmatprep.subr.bf16.mxu0 %v862_v0  ;;  %s788_s28 = scalar_lea.vmem %s1027_s18, 128  ;;  %p795_p11 = scmp.lt.s32.totalorder %s1027_s18, %s793_s29 }
  0x3c   : > { %p789_p10 = scmp.ne.s32.totalorder %s1027_s18, %s788_s28  ;;  %p796_p0 = scmp.lt.s32.totalorder %s794_s8, %s788_s28 }
  0x3d   : > { %647 = vmatmul.mubr.msk.bf16.vlgmr.msra.gmra.mxu0 %vm330_vm1, %v306_v4 }
  0x3e   : > { %662 = vmatprep.mubr.msk.bf16.mxu0 %vm863_vm0, %v862_v0  ;;  %659 = vmatpush3.bf16.msra.mxu0 %v734_v7  ;;  %p790_p12 = pnand %p789_p10, %p943_p5  ;;  %p797_p1 = por %p796_p0, %p795_p11 }
  0x3f   : > { %660 = vmatprep.subr.bf16.mxu0 %v862_v0 }
  0x40   : > { %p791_p8 = pneg %p790_p12 }
  0x42   : > { %661 = vmatpush3.bf16.msra.mxu0 %v735_v16  ;;  %p798_p3 = pnand %p797_p1, %p791_p8 }
  0xfd   : > { %v368_v9 = vpop.f32.mrf.mxu0 }
  0xfe   : > { %v369_v10 = vadd.f32 %v617_v8, %v368_v9 }
  0xff   : > { %v648_v11 = vpop.f32.mrf.mxu0 }
 0x100   : > { %v374_v12 = vmax.f32 %v369_v10, 0.0 }
 0x101   : > { %v371_v13 = vpop.f32.mrf.mxu0 }
 0x102   : > { %v375_v14 = vpack.c.bf16 %v374_v12, %v374_v12 }
 0x103   : > { %v649_v15 = vpop.f32.mrf.mxu0 }
 0x104   : > { %655 = vmatmul.mubr.msk.bf16.vlgmr.msra.gmra.mxu1 %vm330_vm1, %v375_v14 }
 0x1c4   : > { %v436_v18 = vpop.f32.mrf.mxu1 }
 0x1c5   : > { %v437_v19 = vadd.f32 %v621_v17, %v436_v18 }
 0x1c6   : > { %v656_v20 = vpop.f32.mrf.mxu1 }
 0x1c7   : > { %v442_v21 = vmax.f32 %v437_v19, 0.0 }
 0x1c8   : > { %v439_v22 = vpop.f32.mrf.mxu1 }
 0x1c9   : > { %v443_v23 = vpack.c.bf16 %v442_v21, %v442_v21 }
 0x1ca   : > { %v657_v24 = vpop.f32.mrf.mxu1 }
 0x1cb   : > { %663 = vmatmul.mubr.msk.bf16.vlgmr.msra.gmra.mxu0 %vm330_vm1, %v443_v23 }
 0x28b   : > { %v504_v26 = vpop.f32.mrf.mxu0 }
 0x28c   : > { %v505_v27 = vadd.f32 %v625_v25, %v504_v26 }
 0x28d   : > { %v664_v28 = vpop.f32.mrf.mxu0 }
 0x28e   : > { %511 = vst.msk [vmem:[%s299_s17] sm:$0xff] %vm510_vm2, %v505_v27 }
 0x28f   : > { %v507_v29 = vpop.f32.mrf.mxu0 }
 0x290   : > { %801 = shalt.err (!%p798_p3)
}
 0x291   : > { %s802_s13 = scalar_lea.hbm %s1025_s21, 128  ;;  %s806_s15 = scalar_lea.hbm %s1073_s7, 256 }
 0x292   : > { %p803_p2 = scmp.ne.s32.totalorder %s1025_s21, %s802_s13  ;;  %p807_p7 = scmp.lt.s32.totalorder %s1025_s21, %s1073_s7 }
 0x293   : > { %p808_p6 = scmp.lt.s32.totalorder %s806_s15, %s802_s13 }
 0x294   : > { %p804_p4 = pnand %p803_p2, %p943_p5 }
 0x295   : > { %p809_p9 = por %p808_p6, %p807_p7 }
 0x296   : > { %p805_p13 = pneg %p804_p4 }
 0x298   : > { %p810_p10 = pnand %p809_p9, %p805_p13 }
 0x29a   : > { %813 = shalt.err (!%p810_p10)
}
 0x29b   : > { %674 = dma.vmem_to_hbm [thread:$0]  (%p943_p5), %s1027_s18, 128, %s1025_s21, %s513_s22   ;;  %v665_v30 = vpop.f32.mrf.mxu0 }
 0x29c PF: > { %p691_p12 = scmp.ge.s32.totalorder %s856_s27, 2  ;;  %s538_s19 = sand.u32 1, %s844_s24  }
 0x29d   : > { %p1083_p8 = scmp.ne.s32.totalorder %s1076_s12, 0  ;;  %s539_s20 = scalar_lea.sflag [#allocation4], %s538_s19 }
 0x29f   : > { %p684_p11 = pnand %p691_p12, %p1083_p8 }
 0x2a1   : > { %p685_p0 = pneg %p684_p11 }
 0x2a3   : > { %839 = dma.done.wait (%p685_p0), %s539_s20, 128  }
 0x2a4   : > { %841 = vsyncadd (%p685_p0), %s539_s20, 4294967168  ;;  %p19_p1 = scmp.ge.s32.totalorder %s930_s30, 4   ;;  %s1084_s24 = smov %s848_s25 }
 0x2a5   : > { %s1085_s25 = smov %s852_s26  ;;  %s1086_s26 = smov %s941_s10 }
 0x2a6   : > { %s1087_s27 = smov %s930_s30  ;;  %21 = sbr.rel (!%p19_p1) target bundleno = 5 (0x5), region = 92 }
 0x2ab   :  { %544 = vsyncpa [#allocation3], 1 }
 0x2ac   :  { %546 = vsyncpa [#allocation3 + $0x1], 1 }
 0x2ad   :  { %547 = vsyncpa [#allocation6], 1 }
 0x2ae   :  { %548 = vsyncpa [#allocation4], 1 }
 0x2af   :  { %550 = vsyncpa [#allocation4 + $0x1], 1 }

</bundles_post_ra>
